<compile_context>
chip_gen: v5e
topology: v5e:2x2
jax: 0.10.0
libtpu: 0.0.40
codegen_flags: <defaults>
</compile_context>

<pallas_src>
import jax
import jax.numpy as jnp
from jax.experimental import pallas as pl
from jax.experimental.pallas import tpu as pltpu

# ---- arctan (Cephes atanf) constants ----
_TAN_PI_8 = 0.41421356237309503     # tan(pi/8)
_TAN_3PI_8 = 2.414213562373095      # tan(3*pi/8)
_PI_2 = 1.5707963267948966
_PI_4 = 0.7853981633974483

# ---- limited-range sin constants ----
_INV_PI = 0.3183098861837907
_PI_A = 3.140625                    # high part of pi; k*_PI_A exact for |k| <= 3
_PI_B = 9.67653589793e-4            # pi - _PI_A
_SIN_CLAMP = 10.0                   # exp(-x^2) == 0 in f32 well before |x| = 10
_S1 = -1.0 / 6.0                    # odd poly for sin on [-pi/2, pi/2]
_S2 = 1.0 / 120.0
_S3 = -1.0 / 5040.0
_S4 = 1.0 / 362880.0

_TARGET_BLOCK_ELEMS = 1 << 20       # ~4 MiB f32 per block; in+out double-buffered ~16 MiB
_MIN_SPLIT_ROWS = 16                # smallest row count worth splitting into >= 2 blocks


def _exp_atan_sin_kernel(x_ref, o_ref):
    x = x_ref[...].astype(jnp.float32)          # upcast in-kernel; HBM stays input width
    ax = jnp.abs(x)

    # ---- gaussian: EUP slot ----
    gauss = jnp.exp(-(x * x))

    # ---- arctan(|x|): branchless Cephes atanf; divide via EUP approx-rcp + 1 NR ----
    big = ax > _TAN_3PI_8
    mid = ax > _TAN_PI_8
    num = jnp.where(big, jnp.float32(-1.0), ax - 1.0)
    den = jnp.where(big, ax, ax + 1.0)          # den >= 1 whenever the quotient is used
    r = pl.reciprocal(den, approx=True)         # EUP slot (nearly free here)
    r = r * (jnp.float32(2.0) - den * r)        # one Newton step -> ~2^-24 relative
    t = jnp.where(mid, num * r, ax)
    off = jnp.where(big, jnp.float32(_PI_2),
                    jnp.where(mid, jnp.float32(_PI_4), jnp.float32(0.0)))
    z = t * t
    atan_mag = ((((8.05374449538e-2 * z - 1.38776856032e-1) * z
                  + 1.99777106478e-1) * z - 3.33329491539e-1) * z) * t + t + off

    # ---- sin(x), limited range: clamp only the sin argument (gaussian is 0 there) ----
    xs = jnp.clip(x, -_SIN_CLAMP, _SIN_CLAMP)
    k = jnp.round(xs * _INV_PI)                 # |k| <= 3
    y = (xs - k * _PI_A) - k * _PI_B            # Cody-Waite reduction, |y| <= pi/2
    z2 = y * y
    sin_y = y + y * z2 * (_S1 + z2 * (_S2 + z2 * (_S3 + z2 * _S4)))

    # ---- combine magnitudes; restore all signs with one XOR ----
    # f = exp(-x^2) * atan(|x|) * sin(y) * sign(x) * (-1)^k
    p = gauss * atan_mag * sin_y
    ki = k.astype(jnp.int32)
    flip = pltpu.bitcast(ki << 31, jnp.uint32)                       # (-1)^k sign bit
    sgn = pltpu.bitcast(x, jnp.uint32) & jnp.uint32(0x80000000)      # sign(x) bit
    p = pltpu.bitcast(pltpu.bitcast(p, jnp.uint32) ^ (sgn ^ flip), jnp.float32)

    o_ref[...] = p.astype(o_ref.dtype)


def exp_arctan_harmonic(x: jax.Array) -> jax.Array:
    """Applies f(x) = exp(-x^2) * arctan(x) * sin(x) elementwise; preserves shape/dtype."""
    orig_shape = x.shape
    n = x.size
    if n == 0:
        return x

    # Lane-dense layout: widest lane width (multiple of 128) dividing n, so no
    # pad/slice HBM round-trip; otherwise pad only to the 128-lane granule.
    lane = 0
    for cand in (512, 256, 128):
        if n % cand == 0:
            lane = cand
            break
    x_flat = x.reshape(-1)
    if lane == 0:
        lane = 128
        n_pad = pl.cdiv(n, lane) * lane
        x_flat = jnp.pad(x_flat, (0, n_pad - n))     # f(0) = 0 -> zero padding is safe
    else:
        n_pad = n
    rows = n_pad // lane
    x2d = x_flat.reshape(rows, lane)

    # Block rows: multiple of 8, ~4 MiB blocks, and >= 2 grid steps whenever the
    # input is big enough so the "parallel" axis can shard across both v7x TCs.
    max_block_rows = max(8, (_TARGET_BLOCK_ELEMS // lane) // 8 * 8)
    if rows >= _MIN_SPLIT_ROWS:
        block_rows = min(max_block_rows, pl.cdiv(pl.cdiv(rows, 2), 8) * 8)
    else:
        block_rows = rows                            # tiny input: single full-array block
    grid = (pl.cdiv(rows, block_rows),)

    itemsize = jnp.dtype(x.dtype).itemsize
    cost = pl.CostEstimate(flops=48 * n_pad, transcendentals=2 * n_pad,
                           bytes_accessed=2 * n_pad * itemsize)

    out2d = pl.pallas_call(
        _exp_atan_sin_kernel,
        out_shape=jax.ShapeDtypeStruct((rows, lane), x.dtype),
        grid=grid,
        in_specs=[pl.BlockSpec((block_rows, lane), lambda i: (i, 0))],
        out_specs=pl.BlockSpec((block_rows, lane), lambda i: (i, 0)),
        compiler_params=pltpu.CompilerParams(
            dimension_semantics=("parallel",),       # v7x: shard grid across both TCs
            vmem_limit_bytes=32 * 1024 * 1024,       # ~16 MiB used; safe on v5e/v6e/v7x
        ),
        cost_estimate=cost,
    )(x2d)

    out_flat = out2d.reshape(-1)
    if n_pad != n:
        out_flat = out_flat[:n]
    return out_flat.reshape(orig_shape)


if __name__ == "__main__":
    key = jax.random.PRNGKey(0)
    # Small shapes: the main NCHW case, a grid>=2 (ragged last block) case, and
    # a non-128-multiple case that exercises the pad path.
    shapes = [(2, 4, 16, 16), (2, 4, 24, 64), (3, 5, 7, 11)]
    for i, shp in enumerate(shapes):
        x = 3.0 * jax.random.normal(jax.random.fold_in(key, i), shp, dtype=jnp.float32)
        out = jax.block_until_ready(exp_arctan_harmonic(x))
        ref = jnp.exp(-jnp.square(x)) * jnp.arctan(x) * jnp.sin(x)
        assert out.shape == x.shape and out.dtype == x.dtype
        assert jnp.allclose(out, ref, atol=1e-5, rtol=1e-5), f"mismatch vs reference {shp}"
    print("KERNEL_OK")
</pallas_src>

<mosaic_0001>
module attributes {stable_mosaic.version = 11 : i64} {
  func.func @_exp_atan_sin_kernel(%arg0: i32, %arg1: memref<4x512xf32, #tpu.memory_space<vmem>>, %arg2: memref<4x512xf32, #tpu.memory_space<vmem>>) attributes {dimension_semantics = [#tpu.dimension_semantics<parallel>], iteration_bounds = array<i64: 1>, scalar_prefetch = 0 : i64, scratch_operands = 0 : i64, tpu.core_type = #tpu.core_type<tc>, window_params = [{transform_indices = @transform_0, window_bounds = array<i64: 4, 512>}, {transform_indices = @transform_1, window_bounds = array<i64: 4, 512>}]} {
    %c0 = arith.constant 0 : index
    %c0_0 = arith.constant 0 : index
    %0 = vector.load %arg1[%c0, %c0_0] : memref<4x512xf32, #tpu.memory_space<vmem>>, vector<4x512xf32>
    %1 = math.absf %0 : vector<4x512xf32>
    %2 = arith.mulf %0, %0 : vector<4x512xf32>
    %cst = arith.constant 0.000000e+00 : f32
    %3 = vector.broadcast %cst : f32 to vector<4x512xf32>
    %4 = arith.subf %3, %2 : vector<4x512xf32>
    %5 = math.exp %4 : vector<4x512xf32>
    %cst_1 = arith.constant 2.41421366 : f32
    %6 = vector.broadcast %cst_1 : f32 to vector<4x512xf32>
    %7 = arith.cmpf ogt, %1, %6 : vector<4x512xf32>
    %cst_2 = arith.constant 0.414213568 : f32
    %8 = vector.broadcast %cst_2 : f32 to vector<4x512xf32>
    %9 = arith.cmpf ogt, %1, %8 : vector<4x512xf32>
    %cst_3 = arith.constant 1.000000e+00 : f32
    %10 = vector.broadcast %cst_3 : f32 to vector<4x512xf32>
    %11 = arith.subf %1, %10 : vector<4x512xf32>
    %cst_4 = arith.constant -1.000000e+00 : f32
    %12 = vector.broadcast %cst_4 : f32 to vector<4x512xf32>
    %13 = arith.select %7, %12, %11 : vector<4x512xi1>, vector<4x512xf32>
    %cst_5 = arith.constant 1.000000e+00 : f32
    %14 = vector.broadcast %cst_5 : f32 to vector<4x512xf32>
    %15 = arith.addf %1, %14 : vector<4x512xf32>
    %16 = arith.select %7, %1, %15 : vector<4x512xi1>, vector<4x512xf32>
    %17 = tpu.reciprocal %16 {approx = true} : vector<4x512xf32> -> vector<4x512xf32>
    %18 = arith.mulf %16, %17 : vector<4x512xf32>
    %cst_6 = arith.constant 2.000000e+00 : f32
    %19 = vector.broadcast %cst_6 : f32 to vector<4x512xf32>
    %20 = arith.subf %19, %18 : vector<4x512xf32>
    %21 = arith.mulf %17, %20 : vector<4x512xf32>
    %22 = arith.mulf %13, %21 : vector<4x512xf32>
    %23 = arith.select %9, %22, %1 : vector<4x512xi1>, vector<4x512xf32>
    %cst_7 = arith.constant 0.785398185 : f32
    %cst_8 = arith.constant 0.000000e+00 : f32
    %24 = vector.broadcast %cst_7 : f32 to vector<4x512xf32>
    %25 = vector.broadcast %cst_8 : f32 to vector<4x512xf32>
    %26 = arith.select %9, %24, %25 : vector<4x512xi1>, vector<4x512xf32>
    %cst_9 = arith.constant 1.57079637 : f32
    %27 = vector.broadcast %cst_9 : f32 to vector<4x512xf32>
    %28 = arith.select %7, %27, %26 : vector<4x512xi1>, vector<4x512xf32>
    %29 = arith.mulf %23, %23 : vector<4x512xf32>
    %cst_10 = arith.constant 0.0805374458 : f32
    %30 = vector.broadcast %cst_10 : f32 to vector<4x512xf32>
    %31 = arith.mulf %30, %29 : vector<4x512xf32>
    %cst_11 = arith.constant 0.138776854 : f32
    %32 = vector.broadcast %cst_11 : f32 to vector<4x512xf32>
    %33 = arith.subf %31, %32 : vector<4x512xf32>
    %34 = arith.mulf %33, %29 : vector<4x512xf32>
    %cst_12 = arith.constant 0.199777111 : f32
    %35 = vector.broadcast %cst_12 : f32 to vector<4x512xf32>
    %36 = arith.addf %34, %35 : vector<4x512xf32>
    %37 = arith.mulf %36, %29 : vector<4x512xf32>
    %cst_13 = arith.constant 0.333329499 : f32
    %38 = vector.broadcast %cst_13 : f32 to vector<4x512xf32>
    %39 = arith.subf %37, %38 : vector<4x512xf32>
    %40 = arith.mulf %39, %29 : vector<4x512xf32>
    %41 = arith.mulf %40, %23 : vector<4x512xf32>
    %42 = arith.addf %41, %23 : vector<4x512xf32>
    %43 = arith.addf %42, %28 : vector<4x512xf32>
    %cst_14 = arith.constant -1.000000e+01 : f32
    %cst_15 = arith.constant 1.000000e+01 : f32
    %44 = vector.broadcast %cst_14 : f32 to vector<4x512xf32>
    %45 = arith.maximumf %44, %0 : vector<4x512xf32>
    %46 = vector.broadcast %cst_15 : f32 to vector<4x512xf32>
    %47 = arith.minimumf %46, %45 : vector<4x512xf32>
    %cst_16 = arith.constant 0.318309873 : f32
    %48 = vector.broadcast %cst_16 : f32 to vector<4x512xf32>
    %49 = arith.mulf %47, %48 : vector<4x512xf32>
    %50 = math.roundeven %49 : vector<4x512xf32>
    %cst_17 = arith.constant 3.140625 : f32
    %51 = vector.broadcast %cst_17 : f32 to vector<4x512xf32>
    %52 = arith.mulf %50, %51 : vector<4x512xf32>
    %53 = arith.subf %47, %52 : vector<4x512xf32>
    %cst_18 = arith.constant 9.67653584E-4 : f32
    %54 = vector.broadcast %cst_18 : f32 to vector<4x512xf32>
    %55 = arith.mulf %50, %54 : vector<4x512xf32>
    %56 = arith.subf %53, %55 : vector<4x512xf32>
    %57 = arith.mulf %56, %56 : vector<4x512xf32>
    %58 = arith.mulf %56, %57 : vector<4x512xf32>
    %cst_19 = arith.constant 2.75573188E-6 : f32
    %59 = vector.broadcast %cst_19 : f32 to vector<4x512xf32>
    %60 = arith.mulf %57, %59 : vector<4x512xf32>
    %cst_20 = arith.constant -1.98412701E-4 : f32
    %61 = vector.broadcast %cst_20 : f32 to vector<4x512xf32>
    %62 = arith.addf %61, %60 : vector<4x512xf32>
    %63 = arith.mulf %57, %62 : vector<4x512xf32>
    %cst_21 = arith.constant 0.00833333377 : f32
    %64 = vector.broadcast %cst_21 : f32 to vector<4x512xf32>
    %65 = arith.addf %64, %63 : vector<4x512xf32>
    %66 = arith.mulf %57, %65 : vector<4x512xf32>
    %cst_22 = arith.constant -0.166666672 : f32
    %67 = vector.broadcast %cst_22 : f32 to vector<4x512xf32>
    %68 = arith.addf %67, %66 : vector<4x512xf32>
    %69 = arith.mulf %58, %68 : vector<4x512xf32>
    %70 = arith.addf %56, %69 : vector<4x512xf32>
    %71 = arith.mulf %5, %43 : vector<4x512xf32>
    %72 = arith.mulf %71, %70 : vector<4x512xf32>
    %73 = arith.fptosi %50 : vector<4x512xf32> to vector<4x512xi32>
    %c31_i32 = arith.constant 31 : i32
    %74 = vector.broadcast %c31_i32 : i32 to vector<4x512xi32>
    %75 = arith.shli %73, %74 : vector<4x512xi32>
    %76 = tpu.bitcast %75 : vector<4x512xi32> -> vector<4x512xi32>
    %77 = tpu.bitcast %0 : vector<4x512xf32> -> vector<4x512xi32>
    %c-2147483648_i32 = arith.constant -2147483648 : i32
    %78 = vector.broadcast %c-2147483648_i32 : i32 to vector<4x512xi32>
    %79 = arith.andi %77, %78 : vector<4x512xi32>
    %80 = tpu.bitcast %72 : vector<4x512xf32> -> vector<4x512xi32>
    %81 = arith.xori %79, %76 : vector<4x512xi32>
    %82 = arith.xori %80, %81 : vector<4x512xi32>
    %83 = tpu.bitcast %82 : vector<4x512xi32> -> vector<4x512xf32>
    %c0_23 = arith.constant 0 : index
    %c0_24 = arith.constant 0 : index
    %84 = vector.load %arg2[%c0_23, %c0_24] : memref<4x512xf32, #tpu.memory_space<vmem>>, vector<4x512xf32>
    tpu.vector_store %arg2[%c0_23, %c0_24], %83 {strides = array<i32>} : memref<4x512xf32, #tpu.memory_space<vmem>>, vector<4x512xf32>,
    return
  }
  func.func @transform_0(%arg0: i32) -> (i32, i32) {
    %c0_i32 = arith.constant 0 : i32
    %c0_i32_0 = arith.constant 0 : i32
    return %arg0, %c0_i32 : i32, i32
  }
  func.func @transform_1(%arg0: i32) -> (i32, i32) {
    %c0_i32 = arith.constant 0 : i32
    %c0_i32_0 = arith.constant 0 : i32
    return %arg0, %c0_i32 : i32, i32
  }
}

</mosaic_0001>

<bundles_post_ra>
// kernel: tpu_custom_call.1
= control target key start
LH: loop header
LB: loop body
LE: loop exit
PB: predicated region body
PF: predicated region fallthrough
CT: control target
= control target key end

     0   :  { %6 = vsyncpa [#allocation3], 0  ;;  %s374_s0 = inlined_call_operand.hbm [shape: f32[4,512], index: 0, kind: input, shape index: {}]   ;;  %s375_s1 = inlined_call_operand.hbm [shape: f32[4,512], index: 1, kind: output, shape index: {}]  }
   0x1   :  { %7 = vsyncpa [#allocation4], 0  ;;  %s13_s8 = sshll.u32 %s374_s0, 4  ;;  %s285_s9 = smov [#allocation2]   ;;  %s14_s8 = int_to_ptr.hbm [resolvable:$true] %s13_s8 }
   0x2   :  { %s15_s10 = sshll.u32 %s285_s9, 4  ;;  %s16_s10 = int_to_ptr.vmem [resolvable:$true] %s15_s10 }
   0x3   :  { %18 = dma.hbm_to_vmem [thread:$0]  %s14_s8, 256, %s16_s10, [#allocation3]  }
   0x4   :  { %281 = dma.done.wait [#allocation3], 256  }
   0x5   :  { %282 = vsyncadd [#allocation3], 4294967040  ;;  %v301_v0 = vld [vmem:[#allocation2] sm:$0xff]  ;;  %v307_v3 = vld [vmem:[#allocation2 + $0x8] sm:$0xff]  ;;  %vm168_vm6 = vcmask 1043456   ;;  %s287_s0 = smov [#allocation5]  }
   0x6   :  { %v304_v1 = vand.u32 2147483647, %v301_v0  ;;  %v198_v2 = vclamps-f32 %v301_v0, 10.0  ;;  %v312_v6 = vand.u32 2147483647, %v307_v3  ;;  %v199_v7 = vclamps-f32 %v307_v3, 10.0 }
   0x7   :  { %v27_v56 = vmul.f32 %v301_v0, %v301_v0  ;;  %s180_s11 = sshll.u32 %s287_s0, 4  ;;  %s182_s14 = sshll.u32 %s375_s1, 4  ;;  %s181_s11 = int_to_ptr.vmem [resolvable:$true] %s180_s11  ;;  %s183_s14 = int_to_ptr.hbm [resolvable:$true] %s182_s14 }
   0x8   :  { %vm35_vm0 = vcmp.gt.f32.partialorder %v304_v1, 2.4142137  ;;  %v43_v4 = vadd.f32 1.0, %v304_v1  ;;  %v89_v5 = vmul.f32 0.31830987, %v198_v2  ;;  %v44_v14 = vadd.f32 1.0, %v312_v6 }
   0x9   :  { %vm36_vm1 = vcmp.gt.f32.partialorder %v312_v6, 2.4142137  ;;  %v90_v15 = vmul.f32 0.31830987, %v199_v7  ;;  %v192_v24 = vadd.f32 -1.0, %v304_v1  ;;  %v193_v36 = vadd.f32 -1.0, %v312_v6 }
   0xa   :  { %v45_v8 = vsel %vm35_vm0, %v304_v1, %v43_v4  ;;  %v202_v9 = vcvt.f32.s32 %v89_v5  ;;  %v200_v10 = vand.u32 2147483647, %v89_v5  ;;  %v205_v11 = vand.u32 2147483648, %v89_v5 }
   0xb   :  { %225 = vrcp.f32 %v45_v8  ;;  %v46_v17 = vsel %vm36_vm1, %v312_v6, %v44_v14  ;;  %v210_v18 = vcvt.f32.s32 %v90_v15  ;;  %v208_v20 = vand.u32 2147483647, %v90_v15 }
   0xc   :  { %v203_v12 = vcvt.s32.f32 %v202_v9  ;;  %v127_v13 = vshll.u32 %v202_v9, 31  ;;  %vm201_vm2 = vcmp.lt.f32.partialorder %v200_v10, 8388608.0  ;;  %227 = vrcp.f32 %v46_v17 }
   0xd   :  { %v211_v21 = vcvt.s32.f32 %v210_v18  ;;  %v128_v22 = vshll.u32 %v210_v18, 31  ;;  %v213_v26 = vand.u32 2147483648, %v90_v15  ;;  %vm209_vm3 = vcmp.lt.f32.partialorder %v208_v20, 8388608.0 }
   0xe   :  { %v204_v16 = vand.u32 2147483647, %v203_v12  ;;  %129 = vst [vmem:[#allocation1] ss:$2 sm:$0xff] %v127_v13  ;;  %v41_v35 = vsel %vm35_vm0, -1.0, %v192_v24  ;;  %v42_v47 = vsel %vm36_vm1, -1.0, %v193_v36 }
   0xf   :  { %v212_v30 = vand.u32 2147483647, %v211_v21  ;;  %131 = vst [vmem:[#allocation1 + $0x10] ss:$2 sm:$0xff] %v128_v22  ;;  %vm37_vm4 = vcmp.gt.f32.partialorder %v304_v1, 0.41421357 }
  0x10   :  { %v206_v19 = vor.u32 %v205_v11, %v204_v16  ;;  %vm38_vm5 = vcmp.gt.f32.partialorder %v312_v6, 0.41421357 }
  0x11   :  { %v226_v23 = vpop.eup %225  ;;  %v214_v37 = vor.u32 %v213_v26, %v212_v30 }
  0x12   :  { %v207_v25 = vsel %vm201_vm2, %v206_v19, %v89_v5  ;;  %v49_v27 = vmul.f32 %v226_v23, %v45_v8  ;;  %v228_v34 = vpop.eup %227  ;;  %v29_v5 = vsub.f32 0.0, %v27_v56  ;;  %v28_v8 = vmul.f32 %v307_v3, %v307_v3 }
  0x13   :  { %v93_v28 = vmul.f32 3.140625, %v207_v25  ;;  %v97_v29 = vmul.f32 0.0009676536, %v207_v25  ;;  %v50_v41 = vmul.f32 %v228_v34, %v46_v17  ;;  %v215_v42 = vsel %vm209_vm3, %v214_v37, %v90_v15 }
  0x14   :  { %v51_v31 = vsub.f32 2.0, %v49_v27  ;;  %v94_v46 = vmul.f32 3.140625, %v215_v42  ;;  %v98_v48 = vmul.f32 0.0009676536, %v215_v42  ;;  %v31_v15 = vmul.f32 1.442695, %v29_v5 }
  0x15   :  { %v95_v32 = vsub.f32 %v198_v2, %v93_v28  ;;  %v324_v33 = vld.sshfl [vmem:[#allocation1] sm:$0xff pattern:$0x75316420]  ;;  %v329_v38 = vld.sshfl [vmem:[#allocation1 + $0x8] sm:$0xff pattern:$0x75316420] }
  0x16   :  { %v53_v39 = vmul.f32 %v226_v23, %v51_v31  ;;  %138 = vst [vmem:[#allocation1] ss:$2 sm:$0xff] %v301_v0  ;;  %v52_v45 = vsub.f32 2.0, %v50_v41  ;;  %v342_v52 = vld.sshfl [vmem:[#allocation1 + $0x10] sm:$0xff pattern:$0x75316420]  ;;  %v96_v54 = vsub.f32 %v199_v7, %v94_v46  ;;  %229 = vpow2.f32 %v31_v15 }
  0x17   :  { %v331_v40 = vsub.f32 %v95_v32, %v97_v29  ;;  %v345_v55 = vld.sshfl [vmem:[#allocation1 + $0x18] sm:$0xff pattern:$0x75316420]  ;;  %v30_v16 = vsub.f32 0.0, %v28_v8  ;;  %v286_v25 = vmov 0.0  }
  0x18   :  { %v55_v43 = vmul.f32 %v53_v39, %v41_v35  ;;  %v54_v51 = vmul.f32 %v228_v34, %v52_v45  ;;  %140 = vst [vmem:[#allocation1 + $0x10] ss:$2 sm:$0xff] %v307_v3  ;;  %v100_v60 = vsub.f32 %v96_v54, %v98_v48  ;;  %v59_v26 = vsel %vm37_vm4, 0.7853982, %v286_v25 }
  0x19   :  { %v101_v44 = vmul.f32 %v331_v40, %v331_v40  ;;  %v33_v3 = vmul.f32 1.442695, %v30_v16  ;;  %v61_v36 = vsel %vm35_vm0, 1.5707964, %v59_v26  ;;  %v60_v39 = vsel %vm38_vm5, 0.7853982, %v286_v25 }
  0x1a   :  { %v57_v49 = vsel %vm37_vm4, %v55_v43, %v304_v1  ;;  %v56_v58 = vmul.f32 %v54_v51, %v42_v47  ;;  %v102_v4 = vmul.f32 %v100_v60, %v100_v60  ;;  %v62_v47 = vsel %vm36_vm1, 1.5707964, %v60_v39 }
  0x1b   :  { %v105_v50 = vmul.f32 2.7557319e-06, %v101_v44  ;;  %v63_v53 = vmul.f32 %v57_v49, %v57_v49  ;;  %v103_v22 = vmul.f32 %v101_v44, %v331_v40  ;;  %231 = vpow2.f32 %v33_v3 }
  0x1c   :  { %v58_v62 = vsel %vm38_vm5, %v56_v58, %v312_v6  ;;  %v106_v10 = vmul.f32 2.7557319e-06, %v102_v4  ;;  %v104_v30 = vmul.f32 %v102_v4, %v100_v60  ;;  %v230_v42 = vpop.eup %229 }
  0x1d   :  { %v107_v57 = vadd.f32 -0.0001984127, %v105_v50  ;;  %v65_v59 = vmul.f32 0.080537446, %v63_v53  ;;  %v64_v2 = vmul.f32 %v58_v62, %v58_v62 }
  0x1e   :  { %v108_v14 = vadd.f32 -0.0001984127, %v106_v10  ;;  %v142_v56 = vld.sshfl [vmem:[#allocation1 + $0x8] sm:$0xff pattern:$0x75316420] }
  0x1f   :  { %v109_v61 = vmul.f32 %v107_v57, %v101_v44  ;;  %v194_v63 = vadd.f32 -0.13877685, %v65_v59  ;;  %v66_v9 = vmul.f32 0.080537446, %v64_v2  ;;  %v146_v59 = vand.u32 2147483648, %v142_v56 }
  0x20   :  { %v110_v19 = vmul.f32 %v108_v14, %v102_v4 }
  0x21   :  { %v111_v7 = vadd.f32 0.008333334, %v109_v61  ;;  %v69_v0 = vmul.f32 %v194_v63, %v63_v53  ;;  %v195_v13 = vadd.f32 -0.13877685, %v66_v9  ;;  %v232_v51 = vpop.eup %231 }
  0x22   :  { %v112_v24 = vadd.f32 0.008333334, %v110_v19  ;;  %v143_v61 = vld.sshfl [vmem:[#allocation1 + $0x10] sm:$0xff pattern:$0x75316420] }
  0x23   :  { %v113_v11 = vmul.f32 %v111_v7, %v101_v44  ;;  %v71_v12 = vadd.f32 0.19977711, %v69_v0  ;;  %v70_v18 = vmul.f32 %v195_v13, %v64_v2  ;;  %v144_v63 = vld.sshfl [vmem:[#allocation1 + $0x18] sm:$0xff pattern:$0x75316420]  ;;  %v147_v8 = vand.u32 2147483648, %v143_v61 }
  0x24   :  { %v114_v29 = vmul.f32 %v112_v24, %v102_v4  ;;  %v148_v6 = vand.u32 2147483648, %v144_v63 }
  0x25   :  { %v73_v17 = vmul.f32 %v71_v12, %v63_v53  ;;  %v115_v20 = vadd.f32 -0.16666667, %v113_v11  ;;  %v72_v23 = vadd.f32 0.19977711, %v70_v18  ;;  %v160_v13 = vxor.u32 %v147_v8, %v342_v52 }
  0x26   :  { %v116_v35 = vadd.f32 -0.16666667, %v114_v29  ;;  %v161_v9 = vxor.u32 %v148_v6, %v345_v55 }
  0x27   :  { %v196_v21 = vadd.f32 -0.3333295, %v73_v17  ;;  %v74_v28 = vmul.f32 %v72_v23, %v64_v2  ;;  %v117_v32 = vmul.f32 %v115_v20, %v103_v22 }
  0x28   :  { %v118_v46 = vmul.f32 %v116_v35, %v104_v30 }
  0x29   :  { %v77_v27 = vmul.f32 %v196_v21, %v63_v53  ;;  %v197_v34 = vadd.f32 -0.3333295, %v74_v28  ;;  %v119_v44 = vadd.f32 %v117_v32, %v331_v40 }
  0x2a   :  { %v120_v54 = vadd.f32 %v118_v46, %v100_v60 }
  0x2b   :  { %v79_v31 = vmul.f32 %v77_v27, %v57_v49  ;;  %v78_v41 = vmul.f32 %v197_v34, %v64_v2  ;;  %v159_v2 = vxor.u32 %v146_v59, %v329_v38 }
  0x2d   :  { %v81_v37 = vadd.f32 %v79_v31, %v57_v49  ;;  %v80_v45 = vmul.f32 %v78_v41, %v58_v62  ;;  %v141_v49 = vld.sshfl [vmem:[#allocation1] sm:$0xff pattern:$0x75316420] }
  0x2e   :  { %v145_v40 = vand.u32 2147483648, %v141_v49 }
  0x2f   :  { %v83_v43 = vadd.f32 %v81_v37, %v61_v36  ;;  %v82_v50 = vadd.f32 %v80_v45, %v58_v62 }
  0x30   :  { %v158_v62 = vxor.u32 %v145_v40, %v324_v33 }
  0x31   :  { %v121_v48 = vmul.f32 %v230_v42, %v83_v43  ;;  %v84_v53 = vadd.f32 %v82_v50, %v62_v47 }
  0x33   :  { %v123_v1 = vmul.f32 %v121_v48, %v119_v44  ;;  %v122_v57 = vmul.f32 %v232_v51, %v84_v53 }
  0x35   :  { %151 = vst [vmem:[#allocation1] ss:$2 sm:$0xff] %v123_v1  ;;  %v124_v58 = vmul.f32 %v122_v57, %v120_v54 }
  0x37   :  { %153 = vst [vmem:[#allocation1 + $0x10] ss:$2 sm:$0xff] %v124_v58 }
  0x3c   :  { %v154_v4 = vld.sshfl [vmem:[#allocation1] sm:$0xff pattern:$0x75316420]  ;;  %v155_v5 = vld.sshfl [vmem:[#allocation1 + $0x8] sm:$0xff pattern:$0x75316420] }
  0x3d   :  { %v163_v7 = vxor.u32 %v159_v2, %v155_v5  ;;  %v162_v60 = vxor.u32 %v158_v62, %v154_v4 }
  0x3e   :  { %v156_v10 = vld.sshfl [vmem:[#allocation1 + $0x10] sm:$0xff pattern:$0x75316420]  ;;  %v157_v11 = vld.sshfl [vmem:[#allocation1 + $0x18] sm:$0xff pattern:$0x75316420] }
  0x3f   :  { %v166_v0 = vrot.slane %v163_v7, 4  ;;  %v165_v14 = vxor.u32 %v161_v9, %v157_v11  ;;  %v164_v33 = vxor.u32 %v160_v13, %v156_v10 }
  0x41   :  { %v169_v12 = vsel %vm168_vm6, %v162_v60, %v166_v0  ;;  %v167_v38 = vrot.slane %v165_v14, 4 }
  0x42   :  { %173 = vst [vmem:[#allocation5] sm:$0xff] %v169_v12 }
  0x43   :  { %v170_v55 = vsel %vm168_vm6, %v164_v33, %v167_v38 }
  0x44   :  { %174 = vst [vmem:[#allocation5 + $0x8] sm:$0xff] %v170_v55 }
  0x45   :  { %185 = dma.vmem_to_hbm [thread:$0]  %s181_s11, 256, %s183_s14, [#allocation4]  }
  0x46   :  { %283 = dma.done.wait [#allocation4], 256  }
  0x47   :  { %284 = vsyncadd [#allocation4], 4294967040 }
  0x48   :  { %190 = vsyncpa [#allocation3], 1 }
  0x49   :  { %191 = vsyncpa [#allocation4], 1 }

</bundles_post_ra>
